<compile_context>
chip_gen: v7x
topology: tpu7x:2x2x1
jax: 0.10.0
libtpu: 0.0.40
codegen_flags: <defaults>
</compile_context>

<pallas_src>
import functools

import jax
import jax.numpy as jnp
from jax.experimental import pallas as pl
from jax.experimental.pallas import tpu as pltpu

LANES = 128
SUBLANES = 8
MAX_TILE_BYTES = 4 * 1024 * 1024      # ~4 MiB per input block (per buffer)
VMEM_LIMIT_BYTES = 28 * 1024 * 1024   # 2 inputs x 2 buffers x 4 MiB + slack


def _num_core_splits():
    """2-way reduction split only on chips with 2 TensorCores per chip."""
    try:
        kind = jax.devices()[0].device_kind.lower()
    except Exception:
        return 2
    # v5e / v6e ("lite") chips have one TensorCore: a 2-way split is just a
    # serial loop plus (odd block counts) a wasted duplicate-block DMA.
    if "lite" in kind or "v5e" in kind or "v6e" in kind:
        return 1
    return 2


def _wl1_kernel(x_ref, t_ref, o_ref, acc_ref, *, total_rows, tile_rows,
                steps_per_core):
    """grid = (core_split, row_block). acc_ref: per-core (8,128) f32 accumulator."""
    c = pl.program_id(0)
    i = pl.program_id(1)

    @pl.when(i == 0)
    def _():
        acc_ref[...] = jnp.zeros_like(acc_ref)

    # DMA'd in native dtype; upcast on the VPU (free in a mem-bound kernel).
    diff = jnp.abs(x_ref[...].astype(jnp.float32) - t_ref[...].astype(jnp.float32))

    block_idx = c * steps_per_core + i
    # Row-scale arithmetic (not element-scale): no int32 overflow for any
    # realistic n (would need >= 2^38 elements).
    valid_rows = total_rows - block_idx * tile_rows

    # Hot path: interior (full) blocks accumulate unmasked -> purely mem-bound.
    @pl.when(valid_rows >= tile_rows)
    def _():
        acc_ref[...] += diff.reshape(tile_rows // SUBLANES, SUBLANES, LANES).sum(axis=0)

    # Cold path: the (at most one) partial last block, plus any clamped
    # overrun duplicate block from the core split (valid_rows <= 0 -> zeroed).
    @pl.when(valid_rows < tile_rows)
    def _():
        row_id = jax.lax.broadcasted_iota(jnp.int32, (tile_rows, LANES), 0)
        masked = jnp.where(row_id < valid_rows, diff, 0.0)
        acc_ref[...] += masked.reshape(tile_rows // SUBLANES, SUBLANES, LANES).sum(axis=0)

    @pl.when(i == steps_per_core - 1)
    def _():
        # Lane-dense epilogue store of per-core partial sums; the final tiny
        # cross-lane reduction + weight/n scaling happens once in the wrapper.
        o_ref[...] = acc_ref[...]


def weighted_l1_loss(weight, x, target):
    assert x.shape == target.shape, "input/target must match"
    n = int(x.size)
    itemsize = jnp.dtype(x.dtype).itemsize

    xf = x.reshape(-1)
    tf = target.reshape(-1)

    rows = n // LANES
    aligned = rows * LANES

    # Ragged tail (< 128 elements): plain jnp, O(128) work.  Replaces the old
    # full-array jnp.pad (~3x HBM traffic for ragged n).
    if aligned < n:
        tail = jnp.sum(jnp.abs(xf[aligned:].astype(jnp.float32)
                               - tf[aligned:].astype(jnp.float32)))
    else:
        tail = jnp.float32(0.0)

    if rows == 0:
        # Entire input fits in the tail (< 128 elements).
        return tail * (weight / n)

    # TODO(synk): for ragged n the prefix slice still costs one XLA copy per
    # input; a fully copy-free ragged path needs a manual-DMA (pl.ANY) kernel.
    x2 = xf[:aligned].reshape(rows, LANES)
    t2 = tf[:aligned].reshape(rows, LANES)

    # Sub-32-bit dtypes pack along sublanes: row tile must be a multiple of
    # 8 (f32) / 16 (bf16) / 32 (int8/fp8).
    packing = max(1, 4 // itemsize)
    row_align = SUBLANES * packing

    # ~4 MiB per input block: 8192 rows f32 / 16384 rows bf16.
    max_rows = max(row_align,
                   (MAX_TILE_BYTES // (LANES * itemsize)) // row_align * row_align)
    tile_rows = min(max_rows, pl.cdiv(rows, row_align) * row_align)

    num_blocks = pl.cdiv(rows, tile_rows)
    num_splits = min(_num_core_splits(), num_blocks)
    steps_per_core = pl.cdiv(num_blocks, num_splits)
    last_block = num_blocks - 1

    def in_map(c, i):
        # Clamp so the auto-DMA block start never leaves the array; any
        # overrun duplicate block is zeroed by the in-kernel row mask.
        return (jnp.minimum(c * steps_per_core + i, last_block), 0)

    kernel = functools.partial(
        _wl1_kernel, total_rows=rows, tile_rows=tile_rows,
        steps_per_core=steps_per_core)

    out_rows = num_splits * SUBLANES
    cost = pl.CostEstimate(
        flops=3 * aligned,                       # sub + abs + accumulate
        transcendentals=0,
        bytes_accessed=2 * aligned * itemsize + out_rows * LANES * 4)

    partials = pl.pallas_call(
        kernel,
        out_shape=jax.ShapeDtypeStruct((out_rows, LANES), jnp.float32),
        grid_spec=pltpu.PrefetchScalarGridSpec(
            num_scalar_prefetch=0,
            grid=(num_splits, steps_per_core),
            in_specs=[
                # Optional sweep: pipeline_mode=pl.Buffered(3) after profiling.
                pl.BlockSpec((tile_rows, LANES), in_map),
                pl.BlockSpec((tile_rows, LANES), in_map),
            ],
            out_specs=pl.BlockSpec((SUBLANES, LANES), lambda c, i: (c, 0)),
            scratch_shapes=[pltpu.VMEM((SUBLANES, LANES), jnp.float32)],
        ),
        compiler_params=pltpu.CompilerParams(
            # axis 0: independent per-core partials (megacore sharding on
            # multi-TensorCore chips); axis 1: reduction with a resident
            # accumulator/output block.
            # TODO(synk): if a v7x profile shows axis 0 serializing, switch it
            # to pltpu.CORE_PARALLEL.
            dimension_semantics=("parallel", "arbitrary"),
            vmem_limit_bytes=VMEM_LIMIT_BYTES,
        ),
        cost_estimate=cost,
    )(x2, t2)

    # Final tiny reduction of the per-core lane partials + weight / n scaling.
    return (jnp.sum(partials) + tail) * (weight / n)


if __name__ == "__main__":
    weight = 0.75
    key = jax.random.PRNGKey(0)
    k1, k2, k3, k4, k5, k6 = jax.random.split(key, 6)

    # Primary small NCHW case (matches the PyTorch module's usage).
    shape = (2, 4, 16, 16)
    x = jax.random.normal(k1, shape, dtype=jnp.float32)
    t = jax.random.normal(k2, shape, dtype=jnp.float32)
    loss = jax.block_until_ready(weighted_l1_loss(weight, x, t))
    ref = jnp.mean(weight * jnp.abs(x - t))
    assert jnp.allclose(loss, ref, rtol=1e-5, atol=1e-5), (loss, ref)

    # Ragged size (not a multiple of 128): aligned-prefix kernel + jnp tail.
    shape2 = (2, 3, 17, 19)
    x2 = jax.random.normal(k3, shape2, dtype=jnp.float32)
    t2 = jax.random.normal(k4, shape2, dtype=jnp.float32)
    loss2 = jax.block_until_ready(weighted_l1_loss(1.3, x2, t2))
    ref2 = jnp.mean(1.3 * jnp.abs(x2 - t2))
    assert jnp.allclose(loss2, ref2, rtol=1e-5, atol=1e-5), (loss2, ref2)

    # Multi-block case (3 blocks of 8192 rows): exercises unmasked interior
    # blocks, the masked partial last block, the core split, and (on 2-TC
    # chips) the clamped overrun duplicate block.
    shape3 = (2, 9, 256, 512)
    x3 = jax.random.normal(k5, shape3, dtype=jnp.float32)
    t3 = jax.random.normal(k6, shape3, dtype=jnp.float32)
    loss3 = jax.block_until_ready(weighted_l1_loss(weight, x3, t3))
    ref3 = jnp.mean(weight * jnp.abs(x3 - t3))
    assert jnp.allclose(loss3, ref3, rtol=1e-5, atol=1e-5), (loss3, ref3)

    print("KERNEL_OK")
</pallas_src>

<mosaic_0001>
module attributes {stable_mosaic.version = 11 : i64} {
  func.func @_wl1_kernel(%arg0: i32, %arg1: i32, %arg2: memref<16x128xf32, #tpu.memory_space<vmem>>, %arg3: memref<16x128xf32, #tpu.memory_space<vmem>>, %arg4: memref<8x128xf32, #tpu.memory_space<vmem>>, %arg5: memref<8x128xf32, #tpu.memory_space<vmem>>) attributes {dimension_semantics = [#tpu.dimension_semantics<parallel>, #tpu.dimension_semantics<arbitrary>], iteration_bounds = array<i64: 1, 1>, scalar_prefetch = 0 : i64, scratch_operands = 1 : i64, tpu.core_type = #tpu.core_type<tc>, window_params = [{transform_indices = @transform_0, window_bounds = array<i64: 16, 128>}, {transform_indices = @transform_1, window_bounds = array<i64: 16, 128>}, {transform_indices = @transform_2, window_bounds = array<i64: 8, 128>}]} {
    %c0_i32 = arith.constant 0 : i32
    %0 = arith.cmpi eq, %arg1, %c0_i32 : i32
    %1 = arith.extui %0 : i1 to i32
    %c0_i32_0 = arith.constant 0 : i32
    %2 = arith.cmpi ne, %1, %c0_i32_0 : i32
    scf.if %2 {
      %cst = arith.constant 0.000000e+00 : f32
      %20 = vector.broadcast %cst : f32 to vector<8x128xf32>
      %c0_11 = arith.constant 0 : index
      %c0_12 = arith.constant 0 : index
      %21 = vector.load %arg5[%c0_11, %c0_12] : memref<8x128xf32, #tpu.memory_space<vmem>>, vector<8x128xf32>
      tpu.vector_store %arg5[%c0_11, %c0_12], %20 {strides = array<i32>} : memref<8x128xf32, #tpu.memory_space<vmem>>, vector<8x128xf32>,
    } else {
    }
    %c0 = arith.constant 0 : index
    %c0_1 = arith.constant 0 : index
    %3 = vector.load %arg2[%c0, %c0_1] : memref<16x128xf32, #tpu.memory_space<vmem>>, vector<16x128xf32>
    %c0_2 = arith.constant 0 : index
    %c0_3 = arith.constant 0 : index
    %4 = vector.load %arg3[%c0_2, %c0_3] : memref<16x128xf32, #tpu.memory_space<vmem>>, vector<16x128xf32>
    %5 = arith.subf %3, %4 : vector<16x128xf32>
    %6 = math.absf %5 : vector<16x128xf32>
    %c1_i32 = arith.constant 1 : i32
    %7 = arith.muli %arg0, %c1_i32 : i32
    %8 = arith.addi %7, %arg1 : i32
    %c16_i32 = arith.constant 16 : i32
    %9 = arith.muli %8, %c16_i32 : i32
    %c16_i32_4 = arith.constant 16 : i32
    %10 = arith.subi %c16_i32_4, %9 : i32
    %c16_i32_5 = arith.constant 16 : i32
    %11 = arith.cmpi sge, %10, %c16_i32_5 : i32
    %12 = arith.extui %11 : i1 to i32
    %c0_i32_6 = arith.constant 0 : i32
    %13 = arith.cmpi ne, %12, %c0_i32_6 : i32
    scf.if %13 {
      %c0_11 = arith.constant 0 : index
      %c0_12 = arith.constant 0 : index
      %20 = vector.load %arg5[%c0_11, %c0_12] : memref<8x128xf32, #tpu.memory_space<vmem>>, vector<8x128xf32>
      %21 = vector.shape_cast %6 : vector<16x128xf32> to vector<2x8x128xf32>
      %cst = arith.constant dense<0.000000e+00> : vector<8x128xf32>
      %22 = vector.multi_reduction <add>, %21, %cst [0] : vector<2x8x128xf32> to vector<8x128xf32>
      %23 = arith.addf %20, %22 : vector<8x128xf32>
      %c0_13 = arith.constant 0 : index
      %c0_14 = arith.constant 0 : index
      %24 = vector.load %arg5[%c0_13, %c0_14] : memref<8x128xf32, #tpu.memory_space<vmem>>, vector<8x128xf32>
      tpu.vector_store %arg5[%c0_13, %c0_14], %23 {strides = array<i32>} : memref<8x128xf32, #tpu.memory_space<vmem>>, vector<8x128xf32>,
    } else {
    }
    %c16_i32_7 = arith.constant 16 : i32
    %14 = arith.cmpi slt, %10, %c16_i32_7 : i32
    %15 = arith.extui %14 : i1 to i32
    %c0_i32_8 = arith.constant 0 : i32
    %16 = arith.cmpi ne, %15, %c0_i32_8 : i32
    scf.if %16 {
      %20 = tpu.iota {dimensions = array<i32: 0>} : vector<16x128xi32>
      %21 = vector.broadcast %10 : i32 to vector<16x128xi32>
      %22 = arith.cmpi slt, %20, %21 : vector<16x128xi32>
      %cst = arith.constant 0.000000e+00 : f32
      %23 = vector.broadcast %cst : f32 to vector<16x128xf32>
      %24 = arith.select %22, %6, %23 : vector<16x128xi1>, vector<16x128xf32>
      %c0_11 = arith.constant 0 : index
      %c0_12 = arith.constant 0 : index
      %25 = vector.load %arg5[%c0_11, %c0_12] : memref<8x128xf32, #tpu.memory_space<vmem>>, vector<8x128xf32>
      %26 = vector.shape_cast %24 : vector<16x128xf32> to vector<2x8x128xf32>
      %cst_13 = arith.constant dense<0.000000e+00> : vector<8x128xf32>
      %27 = vector.multi_reduction <add>, %26, %cst_13 [0] : vector<2x8x128xf32> to vector<8x128xf32>
      %28 = arith.addf %25, %27 : vector<8x128xf32>
      %c0_14 = arith.constant 0 : index
      %c0_15 = arith.constant 0 : index
      %29 = vector.load %arg5[%c0_14, %c0_15] : memref<8x128xf32, #tpu.memory_space<vmem>>, vector<8x128xf32>
      tpu.vector_store %arg5[%c0_14, %c0_15], %28 {strides = array<i32>} : memref<8x128xf32, #tpu.memory_space<vmem>>, vector<8x128xf32>,
    } else {
    }
    %c0_i32_9 = arith.constant 0 : i32
    %17 = arith.cmpi eq, %arg1, %c0_i32_9 : i32
    %18 = arith.extui %17 : i1 to i32
    %c0_i32_10 = arith.constant 0 : i32
    %19 = arith.cmpi ne, %18, %c0_i32_10 : i32
    scf.if %19 {
      %c0_11 = arith.constant 0 : index
      %c0_12 = arith.constant 0 : index
      %20 = vector.load %arg5[%c0_11, %c0_12] : memref<8x128xf32, #tpu.memory_space<vmem>>, vector<8x128xf32>
      %c0_13 = arith.constant 0 : index
      %c0_14 = arith.constant 0 : index
      %21 = vector.load %arg4[%c0_13, %c0_14] : memref<8x128xf32, #tpu.memory_space<vmem>>, vector<8x128xf32>
      tpu.vector_store %arg4[%c0_13, %c0_14], %20 {strides = array<i32>} : memref<8x128xf32, #tpu.memory_space<vmem>>, vector<8x128xf32>,
    } else {
    }
    return
  }
  func.func @transform_0(%arg0: i32, %arg1: i32) -> (i32, i32) {
    %c1_i32 = arith.constant 1 : i32
    %0 = arith.muli %arg0, %c1_i32 : i32
    %1 = arith.addi %0, %arg1 : i32
    %c0_i32 = arith.constant 0 : i32
    %2 = arith.minsi %1, %c0_i32 : i32
    %c0_i32_0 = arith.constant 0 : i32
    %c0_i32_1 = arith.constant 0 : i32
    return %2, %c0_i32_0 : i32, i32
  }
  func.func @transform_1(%arg0: i32, %arg1: i32) -> (i32, i32) {
    %c1_i32 = arith.constant 1 : i32
    %0 = arith.muli %arg0, %c1_i32 : i32
    %1 = arith.addi %0, %arg1 : i32
    %c0_i32 = arith.constant 0 : i32
    %2 = arith.minsi %1, %c0_i32 : i32
    %c0_i32_0 = arith.constant 0 : i32
    %c0_i32_1 = arith.constant 0 : i32
    return %2, %c0_i32_0 : i32, i32
  }
  func.func @transform_2(%arg0: i32, %arg1: i32) -> (i32, i32) {
    %c0_i32 = arith.constant 0 : i32
    %c0_i32_0 = arith.constant 0 : i32
    return %arg0, %c0_i32 : i32, i32
  }
}

</mosaic_0001>

<bundles_post_ra>
// kernel: tpu_custom_call.1
= control target key start
LH: loop header
LB: loop body
LE: loop exit
PB: predicated region body
PF: predicated region fallthrough
CT: control target
= control target key end

     0   :  { %7 = vsyncpa [#allocation4], 0  ;;  %s258_s0 = inlined_call_operand.hbm [shape: f32[16,128], index: 0, kind: input, shape index: {}]   ;;  %s259_s1 = inlined_call_operand.hbm [shape: f32[16,128], index: 1, kind: input, shape index: {}]   ;;  %s260_s2 = inlined_call_operand.hbm [shape: f32[8,128], index: 2, kind: output, shape index: {}]  }
   0x1   :  { %8 = vsyncpa [#allocation7], 0 }
   0x2   :  { %9 = vsyncpa [#allocation5], 0  ;;  %s202_s9 = smov [#allocation3]   ;;  %s130_s13 = scalar_lea.hbm %s258_s0, 256 }
   0x3   :  { %s21_s10 = sshll.u32 %s202_s9, 4  ;;  %p131_p0 = scmp.ne.s32.totalorder %s258_s0, %s130_s13  ;;  %s22_s10 = int_to_ptr.vmem [resolvable:$true] %s21_s10 }
   0x4   :  { %p134_p1 = scmp.lt.u32.totalorder %s130_s13, %s258_s0 }
   0x6   :  { %p136_p2 = pnand %p134_p1, %p131_p0 }
   0x8   :  { %139 = shalt.err (!%p136_p2)
}
   0x9   :  { %s140_s18 = scalar_lea.vmem %s22_s10, 256  ;;  %p145_p4 = scmp.lt.s32.totalorder %s22_s10, %s22_s10 }
   0xa   :  { %p141_p3 = scmp.ne.s32.totalorder %s22_s10, %s140_s18  ;;  %p146_p5 = scmp.lt.s32.totalorder %s140_s18, %s140_s18 }
   0xc   :  { %p147_p6 = por %p146_p5, %p145_p4 }
   0xe   :  { %p148_p7 = pnand %p147_p6, %p141_p3 }
  0x10   :  { %151 = shalt.err (!%p148_p7)
}
  0x11   :  { %s203_s19 = smov 128   ;;  %s204_s20 = smov 8  }
  0x12   :  { %27 = dma.hbm_to_vmem [thread:$0]  %s258_s0, 256, %s22_s10, [#allocation4], %s203_s19, %s203_s19, %s204_s20  }
  0x13   :  { %s205_s23 = smov [#allocation6]   ;;  %s152_s27 = scalar_lea.hbm %s259_s1, 256 }
  0x14   :  { %s39_s24 = sshll.u32 %s205_s23, 4  ;;  %p153_p8 = scmp.ne.s32.totalorder %s259_s1, %s152_s27  ;;  %s40_s24 = int_to_ptr.vmem [resolvable:$true] %s39_s24 }
  0x15   :  { %p156_p9 = scmp.lt.u32.totalorder %s152_s27, %s259_s1 }
  0x17   :  { %p158_p10 = pnand %p156_p9, %p153_p8 }
  0x19   :  { %161 = shalt.err (!%p158_p10)
}
  0x1a   :  { %s162_s4 = scalar_lea.vmem %s40_s24, 256  ;;  %p167_p12 = scmp.lt.s32.totalorder %s40_s24, %s40_s24 }
  0x1b   :  { %p163_p11 = scmp.ne.s32.totalorder %s40_s24, %s162_s4  ;;  %p168_p13 = scmp.lt.s32.totalorder %s162_s4, %s162_s4 }
  0x1d   :  { %p169_p0 = por %p168_p13, %p167_p12 }
  0x1f   :  { %p170_p1 = pnand %p169_p0, %p163_p11 }
  0x21   :  { %173 = shalt.err (!%p170_p1)
}
  0x22   :  { %45 = dma.hbm_to_vmem [thread:$0]  %s259_s1, 256, %s40_s24, [#allocation7], %s203_s19, %s203_s19, %s204_s20  }
  0x23   :  { %196 = dma.done.wait [#allocation4], 256  }
  0x24   :  { %197 = vsyncadd [#allocation4], 4294967040 }
  0x25   :  { %198 = dma.done.wait [#allocation7], 256  }
  0x26   :  { %199 = vsyncadd [#allocation7], 4294967040  ;;  %v65_v0 = vld [vmem:[#allocation3] sm:$0xff]  ;;  %v66_v1 = vld [vmem:[#allocation3 + $0x8] sm:$0xff]  ;;  %s206_s6 = smov [#allocation8]  }
  0x27   :  { %v67_v2 = vld [vmem:[#allocation6] sm:$0xff]  ;;  %v68_v3 = vld [vmem:[#allocation6 + $0x8] sm:$0xff]  ;;  %s111_s7 = sshll.u32 %s206_s6, 4  ;;  %s112_s7 = int_to_ptr.vmem [resolvable:$true] %s111_s7 }
  0x28   :  { %v69_v4 = vsub.f32 %v65_v0, %v67_v2  ;;  %v70_v5 = vsub.f32 %v66_v1, %v68_v3  ;;  %s174_s8 = scalar_lea.vmem %s112_s7, 128  ;;  %p179_p3 = scmp.lt.s32.totalorder %s112_s7, %s112_s7 }
  0x29   :  { %p175_p2 = scmp.ne.s32.totalorder %s112_s7, %s174_s8  ;;  %p180_p4 = scmp.lt.s32.totalorder %s174_s8, %s174_s8 }
  0x2a   :  { %v71_v6 = vand.u32 2147483647, %v69_v4  ;;  %v72_v7 = vand.u32 2147483647, %v70_v5 }
  0x2b   :  { %p181_p5 = por %p180_p4, %p179_p3 }
  0x2c   :  { %v81_v8 = vadd.f32 %v72_v7, %v71_v6 }
  0x2d   :  { %p182_p6 = pnand %p181_p5, %p175_p2 }
  0x2e   :  { %104 = vst [vmem:[#allocation8] sm:$0xff] %v81_v8 }
  0x2f   :  { %185 = shalt.err (!%p182_p6)
}
  0x30   :  { %s186_s10 = scalar_lea.hbm %s260_s2, 128 }
  0x31   :  { %p187_p7 = scmp.ne.s32.totalorder %s260_s2, %s186_s10  ;;  %p190_p8 = scmp.lt.u32.totalorder %s186_s10, %s260_s2 }
  0x33   :  { %p192_p9 = pnand %p190_p8, %p187_p7 }
  0x35   :  { %195 = shalt.err (!%p192_p9)
}
  0x36   :  { %114 = dma.vmem_to_hbm [thread:$0]  %s112_s7, 128, %s260_s2, [#allocation5]  }
  0x37   :  { %200 = dma.done.wait [#allocation5], 128  }
  0x38   :  { %201 = vsyncadd [#allocation5], 4294967168 }
  0x39   :  { %118 = vsyncpa [#allocation4], 1 }
  0x3a   :  { %119 = vsyncpa [#allocation7], 1 }
  0x3b   :  { %120 = vsyncpa [#allocation5], 1 }

</bundles_post_ra>
